<compile_context>
chip_gen: v6e
topology: v6e:2x2x1
jax: 0.10.0
libtpu: 0.0.40
codegen_flags: <defaults>
</compile_context>

<pallas_src>
import jax
import jax.numpy as jnp
from jax.experimental import pallas as pl
from jax.experimental.pallas import tpu as pltpu


def _round_up(x, m):
    return (x + m - 1) // m * m


def factor_kernel(x_ref, w_ref, o_ref):
    # x_ref: (TM, G*F) packed exposure rows; w_ref: (G*F, G) block-diag beta;
    # o_ref: (TM, G). One MXU matmul = multiply + per-row reduction.
    o_ref[...] = jnp.dot(
        x_ref[...], w_ref[...], preferred_element_type=jnp.float32
    ).astype(o_ref.dtype)


def linear_factor_model(B, beta, *, block_bytes=2 << 20):
    """B: (batch, K, F) float32, beta: (F,) float32 -> (batch, K) float32."""
    batch, K, F = B.shape
    M = batch * K

    # Lane packing factor: fold G rows into the 128-lane dim when possible.
    G = 128 // F if (F < 128 and 128 % F == 0) else 1
    while M % G != 0:          # 128 // F is a power of two -> terminates at 1
        G //= 2
    GF = G * F
    Mp = M // G

    # Free, contiguous view: (batch, K, F) -> (Mp, G*F). No HBM copy.
    x = B.reshape(Mp, GF)

    # Block-diagonal weight: W[g*F + f, g] = beta[f]  (tiny, stays resident).
    eyeG = jnp.eye(G, dtype=B.dtype)
    W = (eyeG[:, None, :] * beta.astype(B.dtype)[None, :, None]).reshape(GF, G)

    # Row-tile size: ~block_bytes per input block, multiple of 8 (f32 sublane),
    # <= half the rows when possible so v7x's two TensorCores both get work.
    tm_bytes = max(8, (block_bytes // (4 * GF)) // 8 * 8)
    tm_half = max(8, _round_up(pl.cdiv(Mp, 2), 8))
    TM = min(tm_bytes, tm_half, _round_up(Mp, 8))
    grid = pl.cdiv(Mp, TM)     # ragged last tile handled by Pallas (no pad)

    cost = pl.CostEstimate(
        flops=2 * Mp * GF * G,
        transcendentals=0,
        bytes_accessed=Mp * GF * 4 + GF * G * 4 + Mp * G * 4,
    )

    out = pl.pallas_call(
        factor_kernel,
        out_shape=jax.ShapeDtypeStruct((Mp, G), B.dtype),
        grid_spec=pl.GridSpec(
            grid=(grid,),
            in_specs=[
                pl.BlockSpec((TM, GF), lambda i: (i, 0)),   # packed exposure tile
                pl.BlockSpec((GF, G), lambda i: (0, 0)),    # tiny constant weight
            ],
            out_specs=pl.BlockSpec((TM, G), lambda i: (i, 0)),
        ),
        compiler_params=pltpu.CompilerParams(
            dimension_semantics=("parallel",),              # independent row tiles
        ),
        cost_estimate=cost,
    )(x, W)

    # (Mp, G) is exactly M elements in row-major order -> free reshape back.
    return out.reshape(batch, K)


if __name__ == "__main__":
    key = jax.random.PRNGKey(0)
    k_x, k_beta, k_x2, k_x3 = jax.random.split(key, 4)

    # Primary small shapes consistent with the module: panels x stocks x factors.
    batch, K, F = 2, 16, 32

    # Deterministic parameter init (stand-in for nn.Linear's uniform init).
    bound = 1.0 / jnp.sqrt(F)
    beta = jax.random.uniform(k_beta, (F,), jnp.float32, -bound, bound)

    # Deterministic factor exposures.
    B = jax.random.normal(k_x, (batch, K, F), jnp.float32)

    r_hat = jax.block_until_ready(linear_factor_model(B, beta))
    r_ref = jnp.einsum("bkf,f->bk", B, beta)
    assert r_hat.shape == (batch, K)
    assert jnp.allclose(r_hat, r_ref, atol=1e-5, rtol=1e-5)

    # Secondary check: packed path with a ragged last tile (Mp = 10, TM = 8).
    batch2, K2 = 2, 20
    B2 = jax.random.normal(k_x2, (batch2, K2, F), jnp.float32)
    r_hat2 = jax.block_until_ready(linear_factor_model(B2, beta))
    r_ref2 = jnp.einsum("bkf,f->bk", B2, beta)
    assert r_hat2.shape == (batch2, K2)
    assert jnp.allclose(r_hat2, r_ref2, atol=1e-5, rtol=1e-5)

    # Tertiary check: M = 21 not divisible by 128//F -> G falls back to 1,
    # multi-tile grid with a partial final tile (unpacked path).
    batch3, K3 = 3, 7
    B3 = jax.random.normal(k_x3, (batch3, K3, F), jnp.float32)
    r_hat3 = jax.block_until_ready(linear_factor_model(B3, beta))
    r_ref3 = jnp.einsum("bkf,f->bk", B3, beta)
    assert r_hat3.shape == (batch3, K3)
    assert jnp.allclose(r_hat3, r_ref3, atol=1e-5, rtol=1e-5)

    print("KERNEL_OK")
</pallas_src>

<mosaic_0001>
module attributes {stable_mosaic.version = 11 : i64} {
  func.func @factor_kernel(%arg0: i32, %arg1: memref<8x128xf32, #tpu.memory_space<vmem>>, %arg2: memref<128x4xf32, #tpu.memory_space<vmem>>, %arg3: memref<8x4xf32, #tpu.memory_space<vmem>>) attributes {dimension_semantics = [#tpu.dimension_semantics<parallel>], iteration_bounds = array<i64: 1>, scalar_prefetch = 0 : i64, scratch_operands = 0 : i64, tpu.core_type = #tpu.core_type<tc>, window_params = [{transform_indices = @transform_0, window_bounds = array<i64: 8, 128>}, {pipeline_mode = #tpu.pipeline_mode<synchronous>, transform_indices = @transform_1, window_bounds = array<i64: 128, 4>}, {transform_indices = @transform_2, window_bounds = array<i64: 8, 4>}]} {
    %c0 = arith.constant 0 : index
    %c0_0 = arith.constant 0 : index
    %0 = vector.load %arg1[%c0, %c0_0] : memref<8x128xf32, #tpu.memory_space<vmem>>, vector<8x128xf32>
    %c0_1 = arith.constant 0 : index
    %c0_2 = arith.constant 0 : index
    %1 = vector.load %arg2[%c0_1, %c0_2] : memref<128x4xf32, #tpu.memory_space<vmem>>, vector<128x4xf32>
    %cst = arith.constant dense<0.000000e+00> : vector<8x4xf32>
    %2 = tpu.matmul %0, %1, %cst {dimension_numbers = #tpu.dot_dimension_numbers<[1], [0], [0], [1], [0, 0, 1, 1], [], []>} : vector<8x128xf32>, vector<128x4xf32>, vector<8x4xf32> -> vector<8x4xf32>
    %c0_3 = arith.constant 0 : index
    %c0_4 = arith.constant 0 : index
    %3 = vector.load %arg3[%c0_3, %c0_4] : memref<8x4xf32, #tpu.memory_space<vmem>>, vector<8x4xf32>
    tpu.vector_store %arg3[%c0_3, %c0_4], %2 {strides = array<i32>} : memref<8x4xf32, #tpu.memory_space<vmem>>, vector<8x4xf32>,
    return
  }
  func.func @transform_0(%arg0: i32) -> (i32, i32) {
    %c0_i32 = arith.constant 0 : i32
    %c0_i32_0 = arith.constant 0 : i32
    return %arg0, %c0_i32 : i32, i32
  }
  func.func @transform_1(%arg0: i32) -> (i32, i32) {
    %c0_i32 = arith.constant 0 : i32
    %c0_i32_0 = arith.constant 0 : i32
    %c0_i32_1 = arith.constant 0 : i32
    return %c0_i32, %c0_i32_0 : i32, i32
  }
  func.func @transform_2(%arg0: i32) -> (i32, i32) {
    %c0_i32 = arith.constant 0 : i32
    %c0_i32_0 = arith.constant 0 : i32
    return %arg0, %c0_i32 : i32, i32
  }
}

</mosaic_0001>

<bundles_post_ra>
// kernel: tpu_custom_call.1
= control target key start
LH: loop header
LB: loop body
LE: loop exit
PB: predicated region body
PF: predicated region fallthrough
CT: control target
= control target key end

     0   :  { %v158_v0 = vmov 0.0   ;;  %vm159_vm0 = vmmov 0   ;;  %vm98_vm1 = vcmask 31744   ;;  %s229_s1 = inlined_call_operand.vmem [shape: f32[128,4], index: 1, kind: input, shape index: {}]   ;;  %s230_s0 = inlined_call_operand.vmem [shape: f32[8,128], index: 0, kind: input, shape index: {}]   ;;  %s231_s2 = inlined_call_operand.vmem [shape: f32[8,4], index: 2, kind: output, shape index: {}]  }
   0x1   :  { %121 = vmatprep.subr.mxu0 %v158_v0  ;;  %v27_v1 = vld [vmem:[%s229_s1 + $0x78] sm:$0xff]  ;;  %v26_v2 = vld [vmem:[%s229_s1 + $0x70] sm:$0xff]  ;;  %153 = vmatprep.mubr.msk.f32.mxu0 %vm159_vm0, %v158_v0  ;;  %v25_v3 = vld [vmem:[%s229_s1 + $0x68] sm:$0xff] }
   0x2   :  { %122 = vmatpush3.msra.mxu0 %v27_v1  ;;  %v24_v4 = vld [vmem:[%s229_s1 + $0x60] sm:$0xff]  ;;  %v23_v5 = vld [vmem:[%s229_s1 + $0x58] sm:$0xff]  ;;  %v22_v6 = vld [vmem:[%s229_s1 + $0x50] sm:$0xff] }
   0x3   :  { %123 = vmatprep.subr.mxu0 %v158_v0  ;;  %v21_v7 = vld [vmem:[%s229_s1 + $0x48] sm:$0xff]  ;;  %v20_v8 = vld [vmem:[%s229_s1 + $0x40] sm:$0xff]  ;;  %v19_v9 = vld [vmem:[%s229_s1 + $0x38] sm:$0xff] }
   0x4   :  { %124 = vmatpush3.msra.mxu0 %v26_v2  ;;  %v18_v10 = vld [vmem:[%s229_s1 + $0x30] sm:$0xff]  ;;  %v17_v11 = vld [vmem:[%s229_s1 + $0x28] sm:$0xff]  ;;  %v16_v12 = vld [vmem:[%s229_s1 + $0x20] sm:$0xff] }
   0x5   :  { %125 = vmatprep.subr.mxu0 %v158_v0  ;;  %v15_v13 = vld [vmem:[%s229_s1 + $0x18] sm:$0xff]  ;;  %v14_v14 = vld [vmem:[%s229_s1 + $0x10] sm:$0xff]  ;;  %v13_v15 = vld [vmem:[%s229_s1 + $0x8] sm:$0xff] }
   0x6   :  { %126 = vmatpush3.msra.mxu0 %v25_v3  ;;  %v12_v16 = vld [vmem:[%s229_s1] sm:$0xff] }
   0x7   :  { %127 = vmatprep.subr.mxu0 %v158_v0  ;;  %v11_v17 = vld [vmem:[%s230_s0] sm:$0xff] }
   0x8   :  { %128 = vmatpush3.msra.mxu0 %v24_v4 }
   0x9   :  { %129 = vmatprep.subr.mxu0 %v158_v0 }
   0xa   :  { %130 = vmatpush3.msra.mxu0 %v23_v5 }
   0xb   :  { %131 = vmatprep.subr.mxu0 %v158_v0 }
   0xc   :  { %132 = vmatpush3.msra.mxu0 %v22_v6 }
   0xd   :  { %133 = vmatprep.subr.mxu0 %v158_v0 }
   0xe   :  { %134 = vmatpush3.msra.mxu0 %v21_v7 }
   0xf   :  { %135 = vmatprep.subr.mxu0 %v158_v0 }
  0x10   :  { %136 = vmatpush3.msra.mxu0 %v20_v8 }
  0x11   :  { %137 = vmatprep.subr.mxu0 %v158_v0 }
  0x12   :  { %138 = vmatpush3.msra.mxu0 %v19_v9 }
  0x13   :  { %139 = vmatprep.subr.mxu0 %v158_v0 }
  0x14   :  { %140 = vmatpush3.msra.mxu0 %v18_v10 }
  0x15   :  { %141 = vmatprep.subr.mxu0 %v158_v0 }
  0x16   :  { %142 = vmatpush3.msra.mxu0 %v17_v11 }
  0x17   :  { %143 = vmatprep.subr.mxu0 %v158_v0 }
  0x18   :  { %144 = vmatpush3.msra.mxu0 %v16_v12 }
  0x19   :  { %145 = vmatprep.subr.mxu0 %v158_v0 }
  0x1a   :  { %146 = vmatpush3.msra.mxu0 %v15_v13 }
  0x1b   :  { %147 = vmatprep.subr.mxu0 %v158_v0 }
  0x1c   :  { %148 = vmatpush3.msra.mxu0 %v14_v14 }
  0x1d   :  { %149 = vmatprep.subr.mxu0 %v158_v0 }
  0x1e   :  { %150 = vmatpush3.msra.mxu0 %v13_v15 }
  0x1f   :  { %151 = vmatprep.subr.mxu0 %v158_v0 }
  0x20   :  { %152 = vmatpush3.msra.mxu0 %v12_v16 }
  0x21   :  { %154 = vmatmul.mubr.f32.vlgmr.msra.gmra.mxu0 %v11_v17 }
  0xe1   :  { %v94_v18 = vpop.f32.mrf.mxu0 }
  0xe2   :  { %99 = vst.msk [vmem:[%s231_s2] sm:$0xff] %vm98_vm1, %v94_v18 }
  0xe3   :  { %v155_v19 = vpop.f32.mrf.mxu0 }

</bundles_post_ra>
